<compile_context>
chip_gen: v7x
topology: tpu7x:2x2x1
jax: 0.10.0
libtpu: 0.0.40
codegen_flags: <defaults>
</compile_context>

<pallas_src>
import functools

import jax
import jax.numpy as jnp
from jax import lax
from jax.experimental import pallas as pl
from jax.experimental.pallas import tpu as pltpu


def _round_up(x, m):
    return ((x + m - 1) // m) * m


# --------------------------------------------------------------------------- #
# Kernel
# --------------------------------------------------------------------------- #
def actor_critic_kernel(state_ref, w1_ref, b1_ref, w2_ref, b2_ref, out_ref, *, a_nvals):
    x = state_ref[...]                        # [Bb, S]   f32
    w1 = w1_ref[...]                          # [S, 2H]   (actor | critic fused)
    w2 = w2_ref[...]                          # [2H, OUT] block-diagonal

    # ---- fused layer 1 (actor | critic): one MXU matmul, f32 accumulate ----
    h = jnp.dot(x.astype(w1.dtype), w1, preferred_element_type=jnp.float32) + b1_ref[...]
    h = jnp.maximum(h, 0.0)                   # ReLU in f32 (v5e-friendly)

    # ---- fused layer 2: cols 0..A-1 = actor logits, col A = critic value ----
    y = jnp.dot(h.astype(w2.dtype), w2, preferred_element_type=jnp.float32) + b2_ref[...]

    col = lax.broadcasted_iota(jnp.int32, y.shape, 1)
    is_logit = col < a_nvals

    # numerically-stable log-softmax restricted to the logit lanes
    masked = jnp.where(is_logit, y, -jnp.inf)
    m = jnp.max(masked, axis=-1, keepdims=True)
    lse = jnp.log(jnp.sum(jnp.exp(masked - m), axis=-1, keepdims=True))
    logp = y - (m + lse)

    # packed output: [log_probs (0..A-1) | value (A) | zeros]
    out = jnp.where(is_logit, logp, jnp.where(col == a_nvals, y, 0.0))
    out_ref[...] = out.astype(out_ref.dtype)


# --------------------------------------------------------------------------- #
# Parameter packing (host side, done once)
# --------------------------------------------------------------------------- #
def pack_params(p, *, weight_dtype=jnp.float32):
    """Fuse actor/critic weights into 2 matmul operands + 2 bias rows.

    weight_dtype=jnp.bfloat16 is recommended on v6e/v7x (bf16-native MXU,
    halves weight DMA bytes); keep f32 on v5e or when tight numerical parity
    with an f32 reference is required. Biases always stay f32 (added after
    f32 accumulation).
    """
    S, H = p["w1a"].shape
    A = p["w2a"].shape[1]
    out_pad = max(8, _round_up(A + 1, 8))     # narrow output: A logits + 1 value

    w1 = jnp.concatenate([p["w1a"], p["w1c"]], axis=1).astype(weight_dtype)   # [S, 2H]
    b1 = jnp.concatenate([p["b1a"], p["b1c"]], axis=1).astype(jnp.float32)    # [1, 2H]

    w2 = jnp.zeros((2 * H, out_pad), weight_dtype)
    w2 = w2.at[:H, :A].set(p["w2a"].astype(weight_dtype))                     # actor block
    w2 = w2.at[H:, A:A + 1].set(p["w2c"].astype(weight_dtype))                # critic block
    b2 = jnp.zeros((1, out_pad), jnp.float32)
    b2 = b2.at[:, :A].set(p["b2a"])
    b2 = b2.at[:, A:A + 1].set(p["b2c"])

    return dict(w1=w1, b1=b1, w2=w2, b2=b2, a_nvals=A, out_pad=out_pad)


# --------------------------------------------------------------------------- #
# Plain-XLA fallback (tiny batches: launch/DMA overhead dominates the kernel)
# --------------------------------------------------------------------------- #
def _xla_forward_packed(state, packed):
    A = packed["a_nvals"]
    h = jnp.maximum(state @ packed["w1"].astype(jnp.float32) + packed["b1"], 0.0)
    y = h @ packed["w2"].astype(jnp.float32) + packed["b2"]
    log_probs = jax.nn.log_softmax(y[:, :A], axis=-1)
    value = y[:, A:A + 1]
    return log_probs, value


# --------------------------------------------------------------------------- #
# Forward wrapper
# --------------------------------------------------------------------------- #
def actor_critic_forward(state, packed, *, block_b=None, min_pallas_batch=256):
    """state: [B, S] float32. Returns (log_probs [B, A], value [B, 1])."""
    B, S = state.shape
    A = packed["a_nvals"]
    out_pad = packed["out_pad"]
    H2 = packed["w1"].shape[1]

    if B < min_pallas_batch:
        return _xla_forward_packed(state, packed)

    if block_b is None:
        if B >= 16:
            # >= 2 grid steps so "parallel" engages both v7x TensorCores;
            # cap at 2048 rows (per-step VMEM ~2.5 MiB, far below any limit).
            block_b = min(_round_up(pl.cdiv(B, 2), 8), 2048)
        else:
            block_b = _round_up(B, 8)
    block_b = _round_up(block_b, 8)           # sublane alignment safeguard
    grid = (pl.cdiv(B, block_b),)             # ragged last block handled by Pallas

    kernel = functools.partial(actor_critic_kernel, a_nvals=A)

    out = pl.pallas_call(
        kernel,
        out_shape=jax.ShapeDtypeStruct((B, out_pad), jnp.float32),
        grid=grid,
        in_specs=[
            pl.BlockSpec((block_b, S), lambda i: (i, 0)),      # batch-tiled state
            pl.BlockSpec((S, H2), lambda i: (0, 0)),           # weights stay resident
            pl.BlockSpec((1, H2), lambda i: (0, 0)),
            pl.BlockSpec((H2, out_pad), lambda i: (0, 0)),
            pl.BlockSpec((1, out_pad), lambda i: (0, 0)),
        ],
        out_specs=pl.BlockSpec((block_b, out_pad), lambda i: (i, 0)),
        compiler_params=pltpu.CompilerParams(dimension_semantics=("parallel",)),
    )(state, packed["w1"], packed["b1"], packed["w2"], packed["b2"])

    log_probs = out[:, :A]
    value = out[:, A:A + 1]
    return log_probs, value


# --------------------------------------------------------------------------- #
# Init + pure-JAX reference (unfused, matches the PyTorch module)
# --------------------------------------------------------------------------- #
def init_params(key, s_nvals, a_nvals, hidden_size):
    """PyTorch nn.Linear-style init (U[-1/sqrt(fan_in), 1/sqrt(fan_in)]).
    Weights stored [in, out]; biases kept 2D [1, out] for TPU-friendly layout."""
    ks = jax.random.split(key, 8)

    def lin(kw, kb, fan_in, fan_out):
        bound = 1.0 / jnp.sqrt(jnp.float32(fan_in))
        w = jax.random.uniform(kw, (fan_in, fan_out), jnp.float32, -bound, bound)
        b = jax.random.uniform(kb, (1, fan_out), jnp.float32, -bound, bound)
        return w, b

    w1a, b1a = lin(ks[0], ks[1], s_nvals, hidden_size)
    w2a, b2a = lin(ks[2], ks[3], hidden_size, a_nvals)
    w1c, b1c = lin(ks[4], ks[5], s_nvals, hidden_size)
    w2c, b2c = lin(ks[6], ks[7], hidden_size, 1)
    return dict(w1a=w1a, b1a=b1a, w2a=w2a, b2a=b2a,
                w1c=w1c, b1c=b1c, w2c=w2c, b2c=b2c)


def reference_forward(state, p):
    h_a = jnp.maximum(state @ p["w1a"] + p["b1a"], 0.0)
    logits = h_a @ p["w2a"] + p["b2a"]
    logp = jax.nn.log_softmax(logits, axis=-1)
    h_c = jnp.maximum(state @ p["w1c"] + p["b1c"], 0.0)
    value = h_c @ p["w2c"] + p["b2c"]
    return logp, value


# --------------------------------------------------------------------------- #
if __name__ == "__main__":
    # s_nvals=16, a_nvals=4, hidden_size=128 (module default).
    B, S_NVALS, A_NVALS, HIDDEN = 8, 16, 4, 128

    key = jax.random.PRNGKey(0)
    k_params, k_state, k_state2 = jax.random.split(key, 3)
    params = init_params(k_params, S_NVALS, A_NVALS, HIDDEN)
    # f32 packing here so the tight numerical check against the f32 reference
    # holds; bf16 packing is exercised (with looser tolerance) below.
    packed_f32 = pack_params(params, weight_dtype=jnp.float32)

    # ---- tiny batch, forced through the Pallas kernel (single grid step) ----
    state = jax.random.normal(k_state, (B, S_NVALS), jnp.float32)
    log_probs, value = actor_critic_forward(state, packed_f32, min_pallas_batch=0)
    log_probs = jax.block_until_ready(log_probs)
    value = jax.block_until_ready(value)

    ref_lp, ref_v = reference_forward(state, params)
    assert log_probs.shape == (B, A_NVALS) and value.shape == (B, 1)
    assert jnp.allclose(log_probs, ref_lp, atol=1e-4, rtol=1e-4), \
        float(jnp.max(jnp.abs(log_probs - ref_lp)))
    assert jnp.allclose(value, ref_v, atol=1e-4, rtol=1e-4), \
        float(jnp.max(jnp.abs(value - ref_v)))

    # ---- larger batch: 2-step grid (megacore split) + ragged last block ----
    B2 = 300
    state2 = jax.random.normal(k_state2, (B2, S_NVALS), jnp.float32)
    lp2, v2 = actor_critic_forward(state2, packed_f32, min_pallas_batch=0)
    lp2 = jax.block_until_ready(lp2)
    v2 = jax.block_until_ready(v2)
    ref_lp2, ref_v2 = reference_forward(state2, params)
    assert lp2.shape == (B2, A_NVALS) and v2.shape == (B2, 1)
    assert jnp.allclose(lp2, ref_lp2, atol=1e-4, rtol=1e-4), \
        float(jnp.max(jnp.abs(lp2 - ref_lp2)))
    assert jnp.allclose(v2, ref_v2, atol=1e-4, rtol=1e-4), \
        float(jnp.max(jnp.abs(v2 - ref_v2)))

    # ---- bf16 weights (production path on v6e/v7x), looser tolerance ----
    packed_bf16 = pack_params(params, weight_dtype=jnp.bfloat16)
    lp3, v3 = actor_critic_forward(state2, packed_bf16, min_pallas_batch=0)
    lp3 = jax.block_until_ready(lp3)
    v3 = jax.block_until_ready(v3)
    assert jnp.allclose(lp3, ref_lp2, atol=5e-2, rtol=5e-2), \
        float(jnp.max(jnp.abs(lp3 - ref_lp2)))
    assert jnp.allclose(v3, ref_v2, atol=5e-2, rtol=5e-2), \
        float(jnp.max(jnp.abs(v3 - ref_v2)))

    print("KERNEL_OK")
</pallas_src>

<mosaic_0001>
module attributes {stable_mosaic.version = 11 : i64} {
  func.func @actor_critic_kernel(%arg0: i32, %arg1: memref<8x16xf32, #tpu.memory_space<vmem>>, %arg2: memref<16x256xf32, #tpu.memory_space<vmem>>, %arg3: memref<1x256xf32, #tpu.memory_space<vmem>>, %arg4: memref<256x8xf32, #tpu.memory_space<vmem>>, %arg5: memref<1x8xf32, #tpu.memory_space<vmem>>, %arg6: memref<8x8xf32, #tpu.memory_space<vmem>>) attributes {dimension_semantics = [#tpu.dimension_semantics<parallel>], iteration_bounds = array<i64: 1>, scalar_prefetch = 0 : i64, scratch_operands = 0 : i64, tpu.core_type = #tpu.core_type<tc>, window_params = [{transform_indices = @transform_0, window_bounds = array<i64: 8, 16>}, {pipeline_mode = #tpu.pipeline_mode<synchronous>, transform_indices = @transform_1, window_bounds = array<i64: 16, 256>}, {pipeline_mode = #tpu.pipeline_mode<synchronous>, transform_indices = @transform_2, window_bounds = array<i64: 1, 256>}, {pipeline_mode = #tpu.pipeline_mode<synchronous>, transform_indices = @transform_3, window_bounds = array<i64: 256, 8>}, {pipeline_mode = #tpu.pipeline_mode<synchronous>, transform_indices = @transform_4, window_bounds = array<i64: 1, 8>}, {transform_indices = @transform_5, window_bounds = array<i64: 8, 8>}]} {
    %c0 = arith.constant 0 : index
    %c0_0 = arith.constant 0 : index
    %0 = vector.load %arg1[%c0, %c0_0] : memref<8x16xf32, #tpu.memory_space<vmem>>, vector<8x16xf32>
    %c0_1 = arith.constant 0 : index
    %c0_2 = arith.constant 0 : index
    %1 = vector.load %arg2[%c0_1, %c0_2] : memref<16x256xf32, #tpu.memory_space<vmem>>, vector<16x256xf32>
    %c0_3 = arith.constant 0 : index
    %c0_4 = arith.constant 0 : index
    %2 = vector.load %arg4[%c0_3, %c0_4] : memref<256x8xf32, #tpu.memory_space<vmem>>, vector<256x8xf32>
    %cst = arith.constant dense<0.000000e+00> : vector<8x256xf32>
    %3 = tpu.matmul %0, %1, %cst {dimension_numbers = #tpu.dot_dimension_numbers<[1], [0], [0], [1], [0, 0, 1, 1], [], []>} : vector<8x16xf32>, vector<16x256xf32>, vector<8x256xf32> -> vector<8x256xf32>
    %c0_5 = arith.constant 0 : index
    %c0_6 = arith.constant 0 : index
    %4 = vector.load %arg3[%c0_5, %c0_6] : memref<1x256xf32, #tpu.memory_space<vmem>>, vector<1x256xf32>
    %5 = vector.broadcast %4 : vector<1x256xf32> to vector<8x256xf32>
    %6 = arith.addf %3, %5 : vector<8x256xf32>
    %cst_7 = arith.constant 0.000000e+00 : f32
    %7 = vector.broadcast %cst_7 : f32 to vector<8x256xf32>
    %8 = arith.maximumf %6, %7 : vector<8x256xf32>
    %cst_8 = arith.constant dense<0.000000e+00> : vector<8x8xf32>
    %9 = tpu.matmul %8, %2, %cst_8 {dimension_numbers = #tpu.dot_dimension_numbers<[1], [0], [0], [1], [0, 0, 1, 1], [], []>} : vector<8x256xf32>, vector<256x8xf32>, vector<8x8xf32> -> vector<8x8xf32>
    %c0_9 = arith.constant 0 : index
    %c0_10 = arith.constant 0 : index
    %10 = vector.load %arg5[%c0_9, %c0_10] : memref<1x8xf32, #tpu.memory_space<vmem>>, vector<1x8xf32>
    %11 = vector.broadcast %10 : vector<1x8xf32> to vector<8x8xf32>
    %12 = arith.addf %9, %11 : vector<8x8xf32>
    %13 = tpu.iota {dimensions = array<i32: 1>} : vector<8x8xi32>
    %c4_i32 = arith.constant 4 : i32
    %14 = vector.broadcast %c4_i32 : i32 to vector<8x8xi32>
    %15 = arith.cmpi slt, %13, %14 : vector<8x8xi32>
    %cst_11 = arith.constant 0xFF800000 : f32
    %16 = vector.broadcast %cst_11 : f32 to vector<8x8xf32>
    %17 = arith.select %15, %12, %16 : vector<8x8xi1>, vector<8x8xf32>
    %cst_12 = arith.constant dense<0xFF800000> : vector<8xf32>
    %18 = vector.multi_reduction <maximumf>, %17, %cst_12 [1] : vector<8x8xf32> to vector<8xf32>
    %19 = vector.shape_cast %18 : vector<8xf32> to vector<8x1xf32>
    %20 = vector.broadcast %19 : vector<8x1xf32> to vector<8x8xf32>
    %21 = arith.subf %17, %20 : vector<8x8xf32>
    %22 = math.exp %21 : vector<8x8xf32>
    %cst_13 = arith.constant dense<0.000000e+00> : vector<8xf32>
    %23 = vector.multi_reduction <add>, %22, %cst_13 [1] : vector<8x8xf32> to vector<8xf32>
    %24 = vector.shape_cast %23 : vector<8xf32> to vector<8x1xf32>
    %25 = math.log %24 : vector<8x1xf32>
    %26 = arith.addf %19, %25 : vector<8x1xf32>
    %27 = vector.broadcast %26 : vector<8x1xf32> to vector<8x8xf32>
    %28 = arith.subf %12, %27 : vector<8x8xf32>
    %c4_i32_14 = arith.constant 4 : i32
    %29 = vector.broadcast %c4_i32_14 : i32 to vector<8x8xi32>
    %30 = arith.cmpi eq, %13, %29 : vector<8x8xi32>
    %cst_15 = arith.constant 0.000000e+00 : f32
    %31 = vector.broadcast %cst_15 : f32 to vector<8x8xf32>
    %32 = arith.select %30, %12, %31 : vector<8x8xi1>, vector<8x8xf32>
    %33 = arith.select %15, %28, %32 : vector<8x8xi1>, vector<8x8xf32>
    %c0_16 = arith.constant 0 : index
    %c0_17 = arith.constant 0 : index
    %34 = vector.load %arg6[%c0_16, %c0_17] : memref<8x8xf32, #tpu.memory_space<vmem>>, vector<8x8xf32>
    tpu.vector_store %arg6[%c0_16, %c0_17], %33 {strides = array<i32>} : memref<8x8xf32, #tpu.memory_space<vmem>>, vector<8x8xf32>,
    return
  }
  func.func @transform_0(%arg0: i32) -> (i32, i32) {
    %c0_i32 = arith.constant 0 : i32
    %c0_i32_0 = arith.constant 0 : i32
    return %arg0, %c0_i32 : i32, i32
  }
  func.func @transform_1(%arg0: i32) -> (i32, i32) {
    %c0_i32 = arith.constant 0 : i32
    %c0_i32_0 = arith.constant 0 : i32
    %c0_i32_1 = arith.constant 0 : i32
    return %c0_i32, %c0_i32_0 : i32, i32
  }
  func.func @transform_2(%arg0: i32) -> (i32, i32) {
    %c0_i32 = arith.constant 0 : i32
    %c0_i32_0 = arith.constant 0 : i32
    %c0_i32_1 = arith.constant 0 : i32
    return %c0_i32, %c0_i32_0 : i32, i32
  }
  func.func @transform_3(%arg0: i32) -> (i32, i32) {
    %c0_i32 = arith.constant 0 : i32
    %c0_i32_0 = arith.constant 0 : i32
    %c0_i32_1 = arith.constant 0 : i32
    return %c0_i32, %c0_i32_0 : i32, i32
  }
  func.func @transform_4(%arg0: i32) -> (i32, i32) {
    %c0_i32 = arith.constant 0 : i32
    %c0_i32_0 = arith.constant 0 : i32
    %c0_i32_1 = arith.constant 0 : i32
    return %c0_i32, %c0_i32_0 : i32, i32
  }
  func.func @transform_5(%arg0: i32) -> (i32, i32) {
    %c0_i32 = arith.constant 0 : i32
    %c0_i32_0 = arith.constant 0 : i32
    return %arg0, %c0_i32 : i32, i32
  }
}

</mosaic_0001>

<bundles_post_ra>
// kernel: tpu_custom_call.1
= control target key start
LH: loop header
LB: loop body
LE: loop exit
PB: predicated region body
PF: predicated region fallthrough
CT: control target
= control target key end

     0   :  { %v363_v5 = vmov 0.0   ;;  %vm70_vm0 = vcmask 130048   ;;  %s529_s0 = inlined_call_operand.vmem [shape: f32[8,16], index: 0, kind: input, shape index: {}]   ;;  %s530_s1 = inlined_call_operand.vmem [shape: f32[16,256], index: 1, kind: input, shape index: {}]   ;;  %s531_s2 = inlined_call_operand.vmem [shape: f32[1,256], index: 2, kind: input, shape index: {}]   ;;  %s532_s3 = inlined_call_operand.vmem [shape: f32[256,8], index: 3, kind: input, shape index: {}]   ;;  %s533_s4 = inlined_call_operand.vmem [shape: f32[1,8], index: 4, kind: input, shape index: {}]   ;;  %s534_s5 = inlined_call_operand.hbm [shape: f32[8,8], index: 5, kind: output, shape index: {}]  }
   0x1   :  { %v23_v0 = vld [vmem:[%s530_s1 + $0x8] sm:$0xff]  ;;  %v25_v1 = vld [vmem:[%s530_s1 + $0x18] sm:$0xff]  ;;  %v22_v2 = vld [vmem:[%s530_s1] sm:$0xff]  ;;  %138 = vmatprep.mubr.f32.mxu0 %v363_v5 }
   0x2   :  { %v297_v3 = vpack.c.bf16 %v25_v1, %v23_v0  ;;  %v24_v4 = vld [vmem:[%s530_s1 + $0x10] sm:$0xff]  ;;  %v42_v6 = vld [vmem:[%s532_s3 + $0x80] sm:$0xff]  ;;  %v43_v9 = vld [vmem:[%s532_s3 + $0x88] sm:$0xff] }
   0x3   :  { %v299_v7 = vpack.c.bf16 %v24_v4, %v22_v2  ;;  %v21_v8 = vld [vmem:[%s529_s0] sm:$0xff]  ;;  %v27_v11 = vld [vmem:[%s532_s3 + $0x8] sm:$0xff]  ;;  %v301_v12 = vpack.c.bf16 %v43_v9, %v42_v6  ;;  %v44_v14 = vld [vmem:[%s532_s3 + $0x90] sm:$0xff] }
   0x4   :  { %v26_v10 = vld [vmem:[%s532_s3] sm:$0xff]  ;;  %298 = vmatprep.subr.bf16.mxu0 %v297_v3  ;;  %v45_v15 = vld [vmem:[%s532_s3 + $0x98] sm:$0xff]  ;;  %v28_v16 = vld [vmem:[%s532_s3 + $0x10] sm:$0xff] }
   0x5   :  { %v303_v13 = vpack.c.bf16 %v27_v11, %v26_v10  ;;  %300 = vmatpush1.bf16.msra.mxu0 %v299_v7  ;;  %v305_v17 = vpack.c.bf16 %v45_v15, %v44_v14  ;;  %v29_v18 = vld [vmem:[%s532_s3 + $0x18] sm:$0xff]  ;;  %v46_v19 = vld [vmem:[%s532_s3 + $0xa0] sm:$0xff]  ;;  %v47_v20 = vld [vmem:[%s532_s3 + $0xa8] sm:$0xff]  ;;  %302 = vmatprep.subr.bf16.mxu1 %v301_v12 }
   0x6   :  { %v307_v21 = vpack.c.bf16 %v29_v18, %v28_v16  ;;  %v309_v22 = vpack.c.bf16 %v47_v20, %v46_v19  ;;  %v30_v23 = vld [vmem:[%s532_s3 + $0x20] sm:$0xff]  ;;  %v31_v24 = vld [vmem:[%s532_s3 + $0x28] sm:$0xff]  ;;  %v48_v25 = vld [vmem:[%s532_s3 + $0xb0] sm:$0xff] }
   0x7   :  { %304 = vmatpush3.bf16.msra.mxu1 %v303_v13  ;;  %v49_v26 = vld [vmem:[%s532_s3 + $0xb8] sm:$0xff]  ;;  %v311_v27 = vpack.c.bf16 %v31_v24, %v30_v23 }
   0x8   :  { %260 = vmatmul.mubr.msk.f32.vlgmr.msra.gmra.mrb[0].mxu0 %vm70_vm0, %v21_v8  ;;  %306 = vmatprep.subr.bf16.mxu1 %v305_v17 }
   0xb   :  { %308 = vmatpush3.bf16.msra.mxu1 %v307_v21 }
   0xc   :  { %10 = vsyncpa [#allocation3], 0  ;;  %310 = vmatprep.subr.bf16.mxu1 %v309_v22  ;;  %v313_v28 = vpack.c.bf16 %v49_v26, %v48_v25  ;;  %v32_v29 = vld [vmem:[%s532_s3 + $0x30] sm:$0xff]  ;;  %v33_v30 = vld [vmem:[%s532_s3 + $0x38] sm:$0xff]  ;;  %v60_v56 = vlaneseq  ;;  %vm228_vm2 = vcmask 64512  }
   0xd   :  { %v50_v31 = vld [vmem:[%s532_s3 + $0xc0] sm:$0xff]  ;;  %v51_v32 = vld [vmem:[%s532_s3 + $0xc8] sm:$0xff]  ;;  %v315_v33 = vpack.c.bf16 %v33_v30, %v32_v29  ;;  %v52_v37 = vld [vmem:[%s532_s3 + $0xd0] sm:$0xff] }
   0xe   :  { %v317_v34 = vpack.c.bf16 %v51_v32, %v50_v31  ;;  %v34_v35 = vld [vmem:[%s532_s3 + $0x40] sm:$0xff]  ;;  %v35_v36 = vld [vmem:[%s532_s3 + $0x48] sm:$0xff]  ;;  %v53_v38 = vld [vmem:[%s532_s3 + $0xd8] sm:$0xff]  ;;  %v61_v57 = vshrl.u32 %v60_v56, 7  ;;  %v225_v5 = vand.u32 127, %v60_v56 }
   0xf   :  { %312 = vmatpush3.bf16.msra.mxu1 %v311_v27  ;;  %v319_v39 = vpack.c.bf16 %v35_v36, %v34_v35  ;;  %v321_v40 = vpack.c.bf16 %v53_v38, %v52_v37  ;;  %v36_v41 = vld [vmem:[%s532_s3 + $0x50] sm:$0xff]  ;;  %v37_v42 = vld [vmem:[%s532_s3 + $0x58] sm:$0xff]  ;;  %v54_v43 = vld [vmem:[%s532_s3 + $0xe0] sm:$0xff] }
  0x10   :  { %314 = vmatprep.subr.bf16.mxu1 %v313_v28  ;;  %v55_v44 = vld [vmem:[%s532_s3 + $0xe8] sm:$0xff]  ;;  %v323_v45 = vpack.c.bf16 %v37_v42, %v36_v41  ;;  %v38_v47 = vld [vmem:[%s532_s3 + $0x60] sm:$0xff]  ;;  %v56_v50 = vld [vmem:[%s532_s3 + $0xf0] sm:$0xff]  ;;  %v62_v58 = vsub.s32 0, %v61_v57  ;;  %v66_v60 = vsub.s32 1, %v61_v57  ;;  %vm226_vm1 = vcmp.lt.s32.totalorder %v225_v5, 4 }
  0x11   :  { %v325_v46 = vpack.c.bf16 %v55_v44, %v54_v43  ;;  %v39_v48 = vld [vmem:[%s532_s3 + $0x68] sm:$0xff]  ;;  %v57_v51 = vld [vmem:[%s532_s3 + $0xf8] sm:$0xff]  ;;  %v40_v53 = vld [vmem:[%s532_s3 + $0x70] sm:$0xff]  ;;  %vm242_vm3 = vcmp.eq.s32.totalorder %v225_v5, 4 }
  0x12   :  { %v327_v49 = vpack.c.bf16 %v39_v48, %v38_v47  ;;  %v329_v52 = vpack.c.bf16 %v57_v51, %v56_v50  ;;  %v41_v54 = vld [vmem:[%s532_s3 + $0x78] sm:$0xff]  ;;  %v58_v59 = vld [vmem:[%s531_s2] sm:$0x3]  ;;  %s364_s2 = smov [#allocation2]  }
  0x13   :  { %316 = vmatpush3.bf16.msra.mxu1 %v315_v33  ;;  %v331_v55 = vpack.c.bf16 %v41_v54, %v40_v53  ;;  %v63_v61 = vrot.slane %v58_v59, %v62_v58  ;;  %v67_v62 = vrot.slane %v58_v59, %v66_v60  ;;  %v261_v7 = vld [vmem:[%s533_s4] ss:$0 sm:$0xff]  ;;  %s252_s4 = sshll.u32 %s364_s2, 4  ;;  %s253_s4 = int_to_ptr.vmem [resolvable:$true] %s252_s4 }
  0x14   :  { %318 = vmatprep.subr.bf16.mxu1 %v317_v34  ;;  %s339_s14 = scalar_lea.vmem %s253_s4, 128  ;;  %p344_p1 = scmp.lt.s32.totalorder %s253_s4, %s253_s4 }
  0x15   :  { %p340_p0 = scmp.ne.s32.totalorder %s253_s4, %s339_s14  ;;  %p345_p2 = scmp.lt.s32.totalorder %s339_s14, %s339_s14 }
  0x17   :  { %320 = vmatpush3.bf16.msra.mxu1 %v319_v39  ;;  %p346_p3 = por %p345_p2, %p344_p1 }
  0x18   :  { %322 = vmatprep.subr.bf16.mxu1 %v321_v40 }
  0x19   :  { %p347_p4 = pnand %p346_p3, %p340_p0 }
  0x1b   :  { %324 = vmatpush3.bf16.msra.mxu1 %v323_v45 }
  0x1c   :  { %326 = vmatprep.subr.bf16.mxu1 %v325_v46 }
  0x1f   :  { %328 = vmatpush3.bf16.msra.mxu1 %v327_v49 }
  0x20   :  { %330 = vmatprep.subr.bf16.mxu1 %v329_v52 }
  0x23   :  { %332 = vmatpush3.bf16.msra.mxu1 %v331_v55 }
  0xdb   :  { %v140_v63 = vpop.f32.mrb[0].mxu0 }
  0xdc   :  { %v141_v0 = vadd.f32 %v140_v63, %v63_v61  ;;  %v142_v1 = vpop.f32.mrb[1].mxu0 }
  0xdd   :  { %v143_v2 = vadd.f32 %v142_v1, %v67_v62 }
  0xde   :  { %v145_v4 = vmax.f32 %v141_v0, 0.0 }
  0xdf   :  { %v146_v3 = vmax.f32 %v143_v2, 0.0 }
  0xe1   :  { %218 = vmatprep.mubr.f32.mxu1 %v146_v3 }
  0xe2   :  { %219 = vmatmul.mubr.f32.vlgmr.msra.gmra.mrb[0].mxu1 %v145_v4 }
 0x1b5   :  { %v294_v6 = vpop.f32.mrb[0].mxu1 }
 0x1b6   :  { %v295_v8 = vpop.f32.mrb[1].mxu1 }
 0x1b7   :  { %v296_v9 = vadd.f32 %v295_v8, %v294_v6 }
 0x1b9   :  { %v221_v10 = vadd.f32 %v296_v9, %v261_v7 }
 0x1bb   :  { %v227_v11 = vsel %vm226_vm1, %v221_v10, -inf  ;;  %v243_v23 = vsel %vm242_vm3, %v221_v10, 0.0 }
 0x1bc   :  { %v229_v12 = vsel %vm228_vm2, %v227_v11, -inf }
 0x1bd   :  { %230 = vmax.xlane.f32.xlu0 %v229_v12 }
 0x24a   :  { %v231_v13 = vpop.xlane.xlu0 %230 }
 0x24b   :  { %v232_v14 = vsub.f32 %v227_v11, %v231_v13 }
 0x24d   :  { %v233_v15 = vmul.f32 1.442695, %v232_v14 }
 0x24f   :  { %335 = vpow2.f32 %v233_v15 }
 0x259   :  { %v336_v16 = vpop.eup %335 }
 0x25a   :  { %v235_v17 = vsel %vm228_vm2, %v336_v16, 0.0 }
 0x25b   :  { %236 = vadd.xlane.f32.xlu0 %v235_v17 }
 0x2e8   :  { %v237_v18 = vpop.xlane.xlu0 %236 }
 0x2e9   :  { %337 = vlog2.f32 %v237_v18 }
 0x2f3   :  { %v338_v19 = vpop.eup %337 }
 0x2f4   :  { %v239_v20 = vmul.f32 0.6931472, %v338_v19 }
 0x2f6   :  { %v240_v21 = vadd.f32 %v239_v20, %v231_v13 }
 0x2f8   :  { %v241_v22 = vsub.f32 %v221_v10, %v240_v21 }
 0x2fa   :  { %v244_v24 = vsel %vm226_vm1, %v241_v22, %v243_v23 }
 0x2fb   :  { %245 = vst.msk [vmem:[#allocation2] sm:$0xff] %vm228_vm2, %v244_v24 }
 0x2fc   :  { %350 = shalt.err (!%p347_p4)
}
 0x2fd   :  { %s351_s17 = scalar_lea.hbm %s534_s5, 128 }
 0x2fe   :  { %p352_p5 = scmp.ne.s32.totalorder %s534_s5, %s351_s17  ;;  %p355_p6 = scmp.lt.u32.totalorder %s351_s17, %s534_s5 }
 0x300   :  { %p357_p7 = pnand %p355_p6, %p352_p5 }
 0x302   :  { %360 = shalt.err (!%p357_p7)
}
 0x303   :  { %255 = dma.vmem_to_hbm [thread:$0]  %s253_s4, 128, %s534_s5, [#allocation3]  }
 0x304   :  { %361 = dma.done.wait [#allocation3], 128  }
 0x305   :  { %362 = vsyncadd [#allocation3], 4294967168 }
 0x306   :  { %259 = vsyncpa [#allocation3], 1 }

</bundles_post_ra>
